<compile_context>
chip_gen: v7x
topology: tpu7x:2x2x1
jax: 0.10.0
libtpu: 0.0.40
codegen_flags: <defaults>
</compile_context>

<pallas_src>
import functools

import jax
import jax.numpy as jnp
import numpy as np
from jax.experimental import pallas as pl
from jax.experimental.pallas import tpu as pltpu

LANE = 128


# ------------------------------ Pallas kernel ------------------------------ #
def _drop_path_kernel(rand_ref, x_ref, o_ref, *, keep_prob):
    """rand_ref: (1,1,LANE) per-sample uniform (lane-broadcast).
       x_ref/o_ref: (1, TS, LANE) lane-dense activation slab."""
    u = rand_ref[...].astype(jnp.float32)
    # floor(keep_prob + u) == 1.0 iff the sample is kept (u >= drop_prob) else 0.0
    mask = jnp.floor(keep_prob + u)
    scale = mask * (1.0 / keep_prob)                     # 0 or 1/keep_prob
    o_ref[...] = (x_ref[...].astype(jnp.float32) * scale).astype(o_ref.dtype)


# -------------------------------- Wrapper ---------------------------------- #
def drop_path(x, rand, drop_prob: float = 0.0, training: bool = False,
              *, max_sublanes_per_block: int = 2048):
    """DropPath forward.

    x:    (B, ...) activation tensor (e.g. NCHW), any rank >= 2.
    rand: (B,) uniform [0,1) samples, one per batch element (plays the role of
          torch.rand(shape) in drop_path_f so results are exactly reproducible).
    """
    if drop_prob == 0.0 or not training:
        return x                                          # identity, like PyTorch
    keep_prob = 1.0 - float(drop_prob)

    B = x.shape[0]
    F = 1
    for d in x.shape[1:]:
        F *= int(d)
    orig_shape, orig_dtype = x.shape, x.dtype

    # Lane-dense layout: (B, F) -> (B, S, 128). Pad only if F % 128 != 0.
    Fp = ((F + LANE - 1) // LANE) * LANE
    xf = x.reshape(B, F)
    if Fp != F:
        xf = jnp.pad(xf, ((0, 0), (0, Fp - F)))
    S = Fp // LANE
    x3 = xf.reshape(B, S, LANE)

    # Sublane tiling: one big block if it fits comfortably, otherwise large
    # 8-aligned tiles (amortizes the ~0.35us per-grid-step overhead).
    if S <= max_sublanes_per_block:
        TS, Sp = S, S                                     # full dim -> always legal
    else:
        TS = max_sublanes_per_block                       # multiple of 8
        Sp = -(-S // TS) * TS
        if Sp != S:
            x3 = jnp.pad(x3, ((0, 0), (0, Sp - S), (0, 0)))
    n_s = Sp // TS

    # Per-sample uniform, broadcast across the 128 lanes (tiny: B*128 floats).
    rand_b = jnp.broadcast_to(
        rand.astype(jnp.float32).reshape(B, 1, 1), (B, 1, LANE))

    out = pl.pallas_call(
        functools.partial(_drop_path_kernel, keep_prob=keep_prob),
        out_shape=jax.ShapeDtypeStruct((B, Sp, LANE), orig_dtype),
        grid=(B, n_s),
        in_specs=[
            pl.BlockSpec((1, 1, LANE), lambda b, j: (b, 0, 0)),
            pl.BlockSpec((1, TS, LANE), lambda b, j: (b, j, 0)),
        ],
        out_specs=pl.BlockSpec((1, TS, LANE), lambda b, j: (b, j, 0)),
        compiler_params=pltpu.CompilerParams(
            dimension_semantics=("parallel", "parallel")),
    )(rand_b, x3)

    out = out.reshape(B, Sp * LANE)
    if Sp * LANE != F:
        out = out[:, :F]
    return out.reshape(orig_shape)


# ------------------------- Pure-JAX reference (check) ----------------------- #
def drop_path_ref(x, rand, drop_prob=0.0, training=False):
    """Mirror of torch drop_path_f, using the same per-sample uniforms."""
    if drop_prob == 0.0 or not training:
        return x
    keep_prob = 1.0 - drop_prob
    shape = (x.shape[0],) + (1,) * (x.ndim - 1)
    random_tensor = jnp.floor(keep_prob + rand.reshape(shape).astype(x.dtype))
    return x / keep_prob * random_tensor


# ----------------------------------- Main ----------------------------------- #
if __name__ == "__main__":
    key = jax.random.PRNGKey(0)
    kx, kr = jax.random.split(key)

    B, C, H, W = 2, 4, 16, 16                 # NCHW like the PyTorch module
    x = jax.random.normal(kx, (B, C, H, W), jnp.float32)
    rand = jax.random.uniform(kr, (B,), jnp.float32)   # the torch.rand samples
    drop_prob = 0.25

    # Training path (kernel executes).
    fwd = jax.jit(functools.partial(drop_path, drop_prob=drop_prob, training=True))
    out = jax.block_until_ready(fwd(x, rand))
    assert out.shape == x.shape, out.shape

    ref = jax.block_until_ready(
        drop_path_ref(x, rand, drop_prob=drop_prob, training=True))
    np.testing.assert_allclose(np.asarray(out), np.asarray(ref),
                               rtol=1e-5, atol=1e-6)

    # Per-sample property: each sample is either all-zero or x / keep_prob.
    keep_prob = 1.0 - drop_prob
    for b in range(B):
        ob = np.asarray(out[b])
        xb = np.asarray(x[b]) / keep_prob
        assert np.allclose(ob, 0.0) or np.allclose(ob, xb, rtol=1e-5, atol=1e-6)

    # Eval / drop_prob == 0 path: exact identity (no kernel, matches PyTorch).
    out_eval = jax.block_until_ready(drop_path(x, rand, drop_prob, training=False))
    np.testing.assert_array_equal(np.asarray(out_eval), np.asarray(x))
    out_p0 = jax.block_until_ready(drop_path(x, rand, 0.0, training=True))
    np.testing.assert_array_equal(np.asarray(out_p0), np.asarray(x))

    print("KERNEL_OK")
</pallas_src>

<mosaic_0001>
module attributes {stable_mosaic.version = 11 : i64} {
  func.func @_drop_path_kernel(%arg0: i32, %arg1: i32, %arg2: memref<1x1x128xf32, #tpu.memory_space<vmem>>, %arg3: memref<1x8x128xf32, #tpu.memory_space<vmem>>, %arg4: memref<1x8x128xf32, #tpu.memory_space<vmem>>) attributes {dimension_semantics = [#tpu.dimension_semantics<parallel>, #tpu.dimension_semantics<parallel>], iteration_bounds = array<i64: 2, 1>, scalar_prefetch = 0 : i64, scratch_operands = 0 : i64, tpu.core_type = #tpu.core_type<tc>, window_params = [{transform_indices = @transform_0, window_bounds = array<i64: 1, 1, 128>}, {transform_indices = @transform_1, window_bounds = array<i64: 1, 8, 128>}, {transform_indices = @transform_2, window_bounds = array<i64: 1, 8, 128>}]} {
    %c0 = arith.constant 0 : index
    %c0_0 = arith.constant 0 : index
    %c0_1 = arith.constant 0 : index
    %0 = vector.load %arg2[%c0, %c0_0, %c0_1] : memref<1x1x128xf32, #tpu.memory_space<vmem>>, vector<1x1x128xf32>
    %cst = arith.constant 7.500000e-01 : f32
    %1 = vector.broadcast %cst : f32 to vector<1x1x128xf32>
    %2 = arith.addf %1, %0 : vector<1x1x128xf32>
    %3 = math.floor %2 : vector<1x1x128xf32>
    %cst_2 = arith.constant 1.33333337 : f32
    %4 = vector.broadcast %cst_2 : f32 to vector<1x1x128xf32>
    %5 = arith.mulf %3, %4 : vector<1x1x128xf32>
    %c0_3 = arith.constant 0 : index
    %c0_4 = arith.constant 0 : index
    %c0_5 = arith.constant 0 : index
    %6 = vector.load %arg3[%c0_3, %c0_4, %c0_5] : memref<1x8x128xf32, #tpu.memory_space<vmem>>, vector<1x8x128xf32>
    %7 = vector.broadcast %5 : vector<1x1x128xf32> to vector<1x8x128xf32>
    %8 = arith.mulf %6, %7 : vector<1x8x128xf32>
    %c0_6 = arith.constant 0 : index
    %c0_7 = arith.constant 0 : index
    %c0_8 = arith.constant 0 : index
    %9 = vector.load %arg4[%c0_6, %c0_7, %c0_8] : memref<1x8x128xf32, #tpu.memory_space<vmem>>, vector<1x8x128xf32>
    tpu.vector_store %arg4[%c0_6, %c0_7, %c0_8], %8 {strides = array<i32>} : memref<1x8x128xf32, #tpu.memory_space<vmem>>, vector<1x8x128xf32>,
    return
  }
  func.func @transform_0(%arg0: i32, %arg1: i32) -> (i32, i32, i32) {
    %c0_i32 = arith.constant 0 : i32
    %c0_i32_0 = arith.constant 0 : i32
    %c0_i32_1 = arith.constant 0 : i32
    return %arg0, %c0_i32, %c0_i32_0 : i32, i32, i32
  }
  func.func @transform_1(%arg0: i32, %arg1: i32) -> (i32, i32, i32) {
    %c0_i32 = arith.constant 0 : i32
    %c0_i32_0 = arith.constant 0 : i32
    return %arg0, %arg1, %c0_i32 : i32, i32, i32
  }
  func.func @transform_2(%arg0: i32, %arg1: i32) -> (i32, i32, i32) {
    %c0_i32 = arith.constant 0 : i32
    %c0_i32_0 = arith.constant 0 : i32
    return %arg0, %arg1, %c0_i32 : i32, i32, i32
  }
}

</mosaic_0001>

<bundles_post_ra>
// kernel: drop_path.1
= control target key start
LH: loop header
LB: loop body
LE: loop exit
PB: predicated region body
PF: predicated region fallthrough
CT: control target
= control target key end

     0   :  { %s352_s9 = smov 0   ;;  %s354_s10 = smov 0   ;;  %s381_s0 = inlined_call_operand.vmem [shape: f32[2,1,128], index: 0, kind: input, shape index: {}]   ;;  %s382_s1 = inlined_call_operand.vmem [shape: f32[2,8,128], index: 1, kind: input, shape index: {}]   ;;  %s383_s2 = inlined_call_operand.vmem [shape: f32[2,8,128], index: 2, kind: output, shape index: {}]  }
   0x1   :  { %s356_s11 = smov 0  }
   0x2 LB: > { %s24_s12 = sadd.s32 1, %s331_s10  ;;  %p284_p0 = scmp.ge.s32.totalorder %s335_s11, 1  ;;  %s335_s11 = sphi %s356_s11, %s12_s11   ;;  %s331_s10 = sphi %s354_s10, %s385_s10   ;;  %s327_s9 = sphi %s352_s9, %s384_s9  }
   0x3   : > { %p26_p1 = scmp.ge.s32.totalorder %s24_s12, 2  ;;  %p138_p2 = scmp.lt.s32.totalorder %s335_s11, 3 }
   0x5   : > { %s387_s12 = smov (%p26_p1, %s24_s12), 0  ;;  %p139_p3 = pnand %p284_p0, %p138_p2 }
   0x6   : > { %p167_p4 = scmp.lt.s32.totalorder (!%p139_p3), %s327_s9, 1  ;;  %v190_v0 = vlaneseq (!%p139_p3) }
   0x7   : > { %142 = sbr.rel (%p139_p3) target bundleno = 28 (0x1c), region = 28 }
   0x8   : > { %v191_v1 = vshrl.u32 (!%p139_p3), %v190_v0, 7 }
   0xa   : > { %v192_v5 = vsub.s32 (!%p139_p3), 0, %v191_v1 }
   0xe   : > { %s389_s9 = smov (!%p167_p4, %s327_s9), 1 }
   0xf   : > { %s169_s15 = scalar_lea.vmem %s381_s0, %s389_s9  ;;  %s285_s16 = sshll.u32 %s389_s9, 3 }
  0x10   : > { %v184_v2 = vld [vmem:[%s169_s15] sm:$0x1]  ;;  %s176_s19 = scalar_lea.vmem %s382_s1, %s285_s16  ;;  %s183_s22 = scalar_lea.vmem %s383_s2, %s285_s16 }
  0x11   : > { %v185_v3 = vadd.f32 0.75, %v184_v2  ;;  %v188_v7 = vld [vmem:[%s176_s19] sm:$0xff] }
  0x13   : > { %v186_v4 = vfloor.f32 %v185_v3 }
  0x15   : > { %v187_v6 = vmul.f32 1.3333334, %v186_v4 }
  0x17   : > { %v193_v8 = vrot.slane %v187_v6, %v192_v5 }
  0x19   : > { %v195_v9 = vmul.f32 %v193_v8, %v188_v7 }
  0x1b   : > { %196 = vst [vmem:[%s183_s22] sm:$0xff] %v195_v9 }
  0x1c PF: > { %s12_s11 = sadd.s32 1, %s335_s11   ;;  %s384_s9 = smov %s331_s10 }
  0x1d   : > { %p9_p5 = scmp.ge.s32.totalorder %s12_s11, 4   ;;  %s385_s10 = smov %s387_s12 }
  0x1f   :  { %11 = sbr.rel (!%p9_p5) target bundleno = 2 (0x2), region = 61 }

</bundles_post_ra>
